<compile_context>
chip_gen: v6e
topology: v6e:2x2x1
jax: 0.10.0
libtpu: 0.0.40
codegen_flags: <defaults>
</compile_context>

<pallas_src>
import functools

import jax
import jax.numpy as jnp
from jax.experimental import pallas as pl
from jax.experimental.pallas import tpu as pltpu


def _spatial_exchange_kernel(x1_ref, x2_ref, o1_ref, o2_ref, *, p_int: int, w: int):
    x1 = x1_ref[...]
    x2 = x2_ref[...]
    # Lane (last-axis flat H*W) index.  Identical for every grid step since we
    # only tile over rows, so the compare chain is cheap, loop-invariant VPU
    # work hidden under the DMAs.
    lane = jax.lax.broadcasted_iota(jnp.int32, x1.shape, dimension=x1.ndim - 1)
    if w % p_int != 0:
        # Recover the original W-column index; only needed when the exchange
        # pattern does not survive collapsing (H, W).
        lane = lane % w
    if (p_int & (p_int - 1)) == 0:
        exch = (lane & (p_int - 1)) == 0      # power-of-two: mod -> bitwise and
    else:
        exch = (lane % p_int) == 0
    # out_x1 takes x2 on exchanged columns, x1 elsewhere; vice versa for out_x2.
    o1_ref[...] = jnp.where(exch, x2, x1)
    o2_ref[...] = jnp.where(exch, x1, x2)


def _choose_row_tile(rows: int, lanes: int, itemsize: int,
                     target_bytes: int = 1 << 20):
    """Rows per tile so one operand tile is ~target_bytes (multiple of 8)."""
    max_rows = max(1, target_bytes // max(1, lanes * itemsize))
    if rows <= max_rows:
        return rows, 1                      # single block == full row extent
    tile_r = max(8, (max_rows // 8) * 8)    # multiple of 8 (sublane tiling)
    return tile_r, pl.cdiv(rows, tile_r)


def spatial_exchange(x1: jax.Array, x2: jax.Array, p: float = 0.5):
    """Pallas implementation of SpatialExchange.forward.

    x1, x2: (B, C, H, W) arrays (NCHW), same shape & dtype.
    Returns (out_x1, out_x2) with the same shape/dtype.
    """
    assert x1.shape == x2.shape and x1.dtype == x2.dtype
    assert 0 < p <= 1
    p_int = int(1 / p)

    B, C, H, W = x1.shape

    # Always lane-dense: collapse (H, W) into the lane axis.
    rows, lanes = B * C, H * W
    x1_2d = x1.reshape(rows, lanes)
    x2_2d = x2.reshape(rows, lanes)

    tile_r, grid_r = _choose_row_tile(rows, lanes, x1.dtype.itemsize)

    kernel = functools.partial(_spatial_exchange_kernel, p_int=p_int, w=W)
    spec = pl.BlockSpec((tile_r, lanes), lambda i: (i, 0))

    out1_2d, out2_2d = pl.pallas_call(
        kernel,
        out_shape=(
            jax.ShapeDtypeStruct((rows, lanes), x1.dtype),
            jax.ShapeDtypeStruct((rows, lanes), x2.dtype),
        ),
        grid=(grid_r,),
        in_specs=[spec, spec],
        out_specs=(spec, spec),
        compiler_params=pltpu.CompilerParams(
            # "parallel": lets v7x shard row tiles across its 2 TensorCores;
            # harmless on single-core v5e/v6e.
            dimension_semantics=("parallel",),
        ),
    )(x1_2d, x2_2d)

    return out1_2d.reshape(B, C, H, W), out2_2d.reshape(B, C, H, W)


def _reference(x1, x2, p=0.5):
    p_int = int(1 / p)
    w = x1.shape[-1]
    exch = (jnp.arange(w) % p_int) == 0
    out1 = jnp.where(exch, x2, x1)
    out2 = jnp.where(exch, x1, x2)
    return out1, out2


def _check(shape, p, key, dtype=jnp.float32):
    k1, k2 = jax.random.split(key)
    x1 = jax.random.normal(k1, shape, dtype=jnp.float32).astype(dtype)
    x2 = jax.random.normal(k2, shape, dtype=jnp.float32).astype(dtype)
    ref1, ref2 = _reference(x1, x2, p=p)
    out1, out2 = spatial_exchange(x1, x2, p=p)
    jax.block_until_ready((out1, out2))
    assert out1.shape == x1.shape and out2.shape == x2.shape
    assert jnp.array_equal(out1, ref1), f"out_x1 mismatch for shape {shape}, p={p}"
    assert jnp.array_equal(out2, ref2), f"out_x2 mismatch for shape {shape}, p={p}"


if __name__ == "__main__":
    key = jax.random.PRNGKey(0)
    keys = jax.random.split(key, 4)

    # Small canonical shape (single tile, W % p_int == 0 fast-mask path).
    _check((2, 4, 16, 16), 0.5, keys[0])
    # Larger shape exercising the multi-tile pipelined path (grid_r > 1),
    # including a ragged last row-block (rows = 65, tile = 32).
    _check((5, 13, 128, 128), 0.5, keys[1])
    # Odd W -> mask needs the (lane % W) recovery path.
    _check((2, 3, 16, 15), 0.5, keys[2])
    # p = 1 (every column swapped) and a non-f32 dtype.
    _check((2, 4, 16, 16), 1.0, keys[3], dtype=jnp.bfloat16)

    print("KERNEL_OK")
</pallas_src>

<mosaic_0001>
module attributes {stable_mosaic.version = 11 : i64} {
  func.func @_spatial_exchange_kernel(%arg0: i32, %arg1: memref<8x256xf32, #tpu.memory_space<vmem>>, %arg2: memref<8x256xf32, #tpu.memory_space<vmem>>, %arg3: memref<8x256xf32, #tpu.memory_space<vmem>>, %arg4: memref<8x256xf32, #tpu.memory_space<vmem>>) attributes {dimension_semantics = [#tpu.dimension_semantics<parallel>], iteration_bounds = array<i64: 1>, scalar_prefetch = 0 : i64, scratch_operands = 0 : i64, tpu.core_type = #tpu.core_type<tc>, window_params = [{transform_indices = @transform_0, window_bounds = array<i64: 8, 256>}, {transform_indices = @transform_1, window_bounds = array<i64: 8, 256>}, {transform_indices = @transform_2, window_bounds = array<i64: 8, 256>}, {transform_indices = @transform_3, window_bounds = array<i64: 8, 256>}]} {
    %c0 = arith.constant 0 : index
    %c0_0 = arith.constant 0 : index
    %0 = vector.load %arg1[%c0, %c0_0] : memref<8x256xf32, #tpu.memory_space<vmem>>, vector<8x256xf32>
    %c0_1 = arith.constant 0 : index
    %c0_2 = arith.constant 0 : index
    %1 = vector.load %arg2[%c0_1, %c0_2] : memref<8x256xf32, #tpu.memory_space<vmem>>, vector<8x256xf32>
    %2 = tpu.iota {dimensions = array<i32: 1>} : vector<8x256xi32>
    %c1_i32 = arith.constant 1 : i32
    %3 = vector.broadcast %c1_i32 : i32 to vector<8x256xi32>
    %4 = arith.andi %2, %3 : vector<8x256xi32>
    %c0_i32 = arith.constant 0 : i32
    %5 = vector.broadcast %c0_i32 : i32 to vector<8x256xi32>
    %6 = arith.cmpi eq, %4, %5 : vector<8x256xi32>
    %7 = arith.select %6, %1, %0 : vector<8x256xi1>, vector<8x256xf32>
    %c0_3 = arith.constant 0 : index
    %c0_4 = arith.constant 0 : index
    %8 = vector.load %arg3[%c0_3, %c0_4] : memref<8x256xf32, #tpu.memory_space<vmem>>, vector<8x256xf32>
    tpu.vector_store %arg3[%c0_3, %c0_4], %7 {strides = array<i32>} : memref<8x256xf32, #tpu.memory_space<vmem>>, vector<8x256xf32>,
    %9 = arith.select %6, %0, %1 : vector<8x256xi1>, vector<8x256xf32>
    %c0_5 = arith.constant 0 : index
    %c0_6 = arith.constant 0 : index
    %10 = vector.load %arg4[%c0_5, %c0_6] : memref<8x256xf32, #tpu.memory_space<vmem>>, vector<8x256xf32>
    tpu.vector_store %arg4[%c0_5, %c0_6], %9 {strides = array<i32>} : memref<8x256xf32, #tpu.memory_space<vmem>>, vector<8x256xf32>,
    return
  }
  func.func @transform_0(%arg0: i32) -> (i32, i32) {
    %c0_i32 = arith.constant 0 : i32
    %c0_i32_0 = arith.constant 0 : i32
    return %arg0, %c0_i32 : i32, i32
  }
  func.func @transform_1(%arg0: i32) -> (i32, i32) {
    %c0_i32 = arith.constant 0 : i32
    %c0_i32_0 = arith.constant 0 : i32
    return %arg0, %c0_i32 : i32, i32
  }
  func.func @transform_2(%arg0: i32) -> (i32, i32) {
    %c0_i32 = arith.constant 0 : i32
    %c0_i32_0 = arith.constant 0 : i32
    return %arg0, %c0_i32 : i32, i32
  }
  func.func @transform_3(%arg0: i32) -> (i32, i32) {
    %c0_i32 = arith.constant 0 : i32
    %c0_i32_0 = arith.constant 0 : i32
    return %arg0, %c0_i32 : i32, i32
  }
}

</mosaic_0001>

<bundles_post_ra>
// kernel: tpu_custom_call.1
= control target key start
LH: loop header
LB: loop body
LE: loop exit
PB: predicated region body
PF: predicated region fallthrough
CT: control target
= control target key end

     0   :  { %9 = vsyncpa [#allocation3], 0  ;;  %s216_s0 = inlined_call_operand.hbm [shape: f32[8,256], index: 0, kind: input, shape index: {}]   ;;  %s217_s1 = inlined_call_operand.hbm [shape: f32[8,256], index: 1, kind: input, shape index: {}]   ;;  %s218_s2 = inlined_call_operand.hbm [shape: f32[8,256], index: 2, kind: output, shape index: {0}]   ;;  %s219_s3 = inlined_call_operand.hbm [shape: f32[8,256], index: 3, kind: output, shape index: {1}]  }
   0x1   :  { %10 = vsyncpa [#allocation6], 0 }
   0x2   :  { %11 = vsyncpa [#allocation4], 0 }
   0x3   :  { %12 = vsyncpa [#allocation9], 0  ;;  %s180_s12 = smov [#allocation2]   ;;  %s181_s14 = smov [#allocation5]  }
   0x4   :  { %s19_s13 = sshll.u32 %s180_s12, 4  ;;  %s29_s15 = sshll.u32 %s181_s14, 4  ;;  %s20_s13 = int_to_ptr.vmem [resolvable:$true] %s19_s13  ;;  %s30_s15 = int_to_ptr.vmem [resolvable:$true] %s29_s15 }
   0x5   :  { %s100_s16 = scalar_lea.vmem %s20_s13, 256  ;;  %p105_p1 = scmp.lt.s32.totalorder %s20_s13, %s20_s13 }
   0x6   :  { %p101_p0 = scmp.ne.s32.totalorder %s20_s13, %s100_s16  ;;  %p106_p2 = scmp.lt.s32.totalorder %s100_s16, %s100_s16 }
   0x8   :  { %p107_p3 = por %p106_p2, %p105_p1 }
   0xa   :  { %p108_p4 = pnand %p107_p3, %p101_p0 }
   0xc   :  { %111 = shalt.err (!%p108_p4)
}
   0xd   :  { %22 = dma.hbm_to_vmem [thread:$0]  %s216_s0, 256, %s20_s13, [#allocation3]  }
   0xe   :  { %s120_s19 = scalar_lea.vmem %s30_s15, 256  ;;  %p125_p6 = scmp.lt.s32.totalorder %s30_s15, %s30_s15 }
   0xf   :  { %p121_p5 = scmp.ne.s32.totalorder %s30_s15, %s120_s19  ;;  %p126_p7 = scmp.lt.s32.totalorder %s120_s19, %s120_s19 }
  0x11   :  { %p127_p8 = por %p126_p7, %p125_p6 }
  0x13   :  { %p128_p9 = pnand %p127_p8, %p121_p5 }
  0x15   :  { %131 = shalt.err (!%p128_p9)
}
  0x16   :  { %32 = dma.hbm_to_vmem [thread:$0]  %s217_s1, 256, %s30_s15, [#allocation6]  }
  0x17   :  { %172 = dma.done.wait [#allocation3], 256  }
  0x18   :  { %173 = vsyncadd [#allocation3], 4294967040 }
  0x19   :  { %174 = dma.done.wait [#allocation6], 256  }
  0x1a   :  { %175 = vsyncadd [#allocation6], 4294967040  ;;  %v43_v0 = vlaneseq  ;;  %s182_s0 = smov [#allocation7]   ;;  %s183_s23 = smov [#allocation8]   ;;  %v39_v5 = vld [vmem:[#allocation2] sm:$0xff]  ;;  %v41_v6 = vld [vmem:[#allocation5] sm:$0xff] }
  0x1b   :  { %s64_s22 = sshll.u32 %s182_s0, 4  ;;  %s74_s24 = sshll.u32 %s183_s23, 4  ;;  %v40_v7 = vld [vmem:[#allocation2 + $0x8] sm:$0xff]  ;;  %v42_v9 = vld [vmem:[#allocation5 + $0x8] sm:$0xff]  ;;  %s65_s22 = int_to_ptr.vmem [resolvable:$true] %s64_s22  ;;  %s75_s24 = int_to_ptr.vmem [resolvable:$true] %s74_s24 }
  0x1c   :  { %v44_v1 = vand.u32 127, %v43_v0  ;;  %s132_s1 = scalar_lea.vmem %s65_s22, 256  ;;  %p137_p11 = scmp.lt.s32.totalorder %s65_s22, %s65_s22 }
  0x1d   :  { %p133_p10 = scmp.ne.s32.totalorder %s65_s22, %s132_s1  ;;  %p138_p12 = scmp.lt.s32.totalorder %s132_s1, %s132_s1 }
  0x1e   :  { %v46_v2 = vand.u32 1, %v44_v1  ;;  %v45_v3 = vadd.s32 128, %v44_v1 }
  0x1f   :  { %p139_p13 = por %p138_p12, %p137_p11 }
  0x20   :  { %vm48_vm0 = vcmp.eq.s32.totalorder %v46_v2, 0  ;;  %v47_v4 = vand.u32 1, %v45_v3 }
  0x21   :  { %v50_v8 = vsel %vm48_vm0, %v41_v6, %v39_v5  ;;  %v54_v10 = vsel %vm48_vm0, %v39_v5, %v41_v6  ;;  %p140_p0 = pnand %p139_p13, %p133_p10 }
  0x22   :  { %vm49_vm1 = vcmp.eq.s32.totalorder %v47_v4, 0  ;;  %52 = vst [vmem:[#allocation7] sm:$0xff] %v50_v8  ;;  %56 = vst [vmem:[#allocation8] sm:$0xff] %v54_v10 }
  0x23   :  { %v51_v11 = vsel %vm49_vm1, %v42_v9, %v40_v7  ;;  %v55_v12 = vsel %vm49_vm1, %v40_v7, %v42_v9 }
  0x24   :  { %53 = vst [vmem:[#allocation7 + $0x8] sm:$0xff] %v51_v11  ;;  %57 = vst [vmem:[#allocation8 + $0x8] sm:$0xff] %v55_v12 }
  0x25   :  { %143 = shalt.err (!%p140_p0)
}
  0x26   :  { %67 = dma.vmem_to_hbm [thread:$0]  %s65_s22, 256, %s218_s2, [#allocation4]  }
  0x27   :  { %s152_s27 = scalar_lea.vmem %s75_s24, 256  ;;  %p157_p2 = scmp.lt.s32.totalorder %s75_s24, %s75_s24 }
  0x28   :  { %p153_p1 = scmp.ne.s32.totalorder %s75_s24, %s152_s27  ;;  %p158_p3 = scmp.lt.s32.totalorder %s152_s27, %s152_s27 }
  0x2a   :  { %p159_p4 = por %p158_p3, %p157_p2 }
  0x2c   :  { %p160_p5 = pnand %p159_p4, %p153_p1 }
  0x2e   :  { %163 = shalt.err (!%p160_p5)
}
  0x2f   :  { %77 = dma.vmem_to_hbm [thread:$0]  %s75_s24, 256, %s219_s3, [#allocation9]  }
  0x30   :  { %176 = dma.done.wait [#allocation4], 256  }
  0x31   :  { %177 = vsyncadd [#allocation4], 4294967040 }
  0x32   :  { %178 = dma.done.wait [#allocation9], 256  }
  0x33   :  { %179 = vsyncadd [#allocation9], 4294967040 }
  0x34   :  { %84 = vsyncpa [#allocation3], 1 }
  0x35   :  { %85 = vsyncpa [#allocation6], 1 }
  0x36   :  { %86 = vsyncpa [#allocation4], 1 }
  0x37   :  { %87 = vsyncpa [#allocation9], 1 }

</bundles_post_ra>
